<compile_context>
chip_gen: v5e
topology: v5e:2x2
jax: 0.10.0
libtpu: 0.0.40
codegen_flags: <defaults>
</compile_context>

<pallas_src>
import functools

import numpy as np
import jax
import jax.numpy as jnp
from jax.experimental import pallas as pl
from jax.experimental.pallas import tpu as pltpu

_BN_EPS = 1e-5
_MXU_DTYPE = jnp.bfloat16      # MXU operand dtype; accumulation stays f32
_Z_DTYPE = jnp.bfloat16        # inter-pass z dtype (halves z HBM traffic)
_TM_MAX = 1024                 # M (lane) tile; multiple of 128, keep <= ~2048


# ---------------------------------------------------------------------------
# Generation-aware compiler params
# ---------------------------------------------------------------------------
@functools.lru_cache(maxsize=1)
def _vmem_limit_bytes():
    """~3/4 of physical VMEM: 48 MiB on v7x (64 MiB), 96 MiB on v5e/v6e."""
    try:
        phys = int(pltpu.get_tpu_info().vmem_capacity_bytes)
    except Exception:
        phys = 64 * 1024 * 1024        # conservative (v7x-sized) fallback
    return min((phys * 3) // 4, 96 * 1024 * 1024)


def _mosaic_params(sem):
    return pltpu.CompilerParams(dimension_semantics=sem,
                                vmem_limit_bytes=_vmem_limit_bytes())


# ---------------------------------------------------------------------------
# Pallas kernels
# ---------------------------------------------------------------------------
def _conv_stats_kernel(p_ref, w_ref, cb_ref, z_ref, sum_ref, ssq_ref):
    """Pass 1: z = W @ patches + bias (one packed MXU matmul, K = 9*Cin).
    Emits bf16 z plus PER-TILE per-channel sum / sum-of-squares (f32, computed
    before the downcast), so the M grid axis is fully 'parallel'."""
    z = jnp.dot(w_ref[...], p_ref[...], preferred_element_type=jnp.float32)
    z = z + cb_ref[...]                        # (Cout, 1) broadcast over lanes
    sum_ref[...] = jnp.sum(z, axis=1, keepdims=True)[None]
    ssq_ref[...] = jnp.sum(z * z, axis=1, keepdims=True)[None]
    z_ref[...] = z.astype(z_ref.dtype)


def _bn_relu_kernel(z_ref, scale_ref, shift_ref, o_ref):
    """Pass 2: per-channel affine (folded BN) + ReLU."""
    z = z_ref[...].astype(jnp.float32)
    o_ref[...] = jnp.maximum(z * scale_ref[...] + shift_ref[...], 0.0)


def _bn_relu_skip_kernel(z_ref, scale_ref, shift_ref, skip_ref, o_ref):
    """Pass 2 with fused residual skip (x + relu(bn(conv(...))))."""
    z = z_ref[...].astype(jnp.float32)
    y = jnp.maximum(z * scale_ref[...] + shift_ref[...], 0.0)
    o_ref[...] = y + skip_ref[...]


# ---------------------------------------------------------------------------
# JAX glue: packed im2col, 2-tap bilinear upsample, tiling helper
# ---------------------------------------------------------------------------
def _tile_m(m):
    """Pick TM (multiple of 128, <= _TM_MAX) and M padded to a multiple of TM."""
    m128 = -(-m // 128) * 128
    tm = min(_TM_MAX, m128)
    m_pad = -(-m128 // tm) * tm
    return tm, m_pad


def _im2col_cm(x, stride):
    """x: (C, N, H, W) -> packed patches (9*C, N*Ho*Wo) for a 3x3/pad-1 conv.
    Row index = tap*C + channel; cast to bf16 for the MXU."""
    C, N, H, W = x.shape
    Ho = (H + 2 - 3) // stride + 1
    Wo = (W + 2 - 3) // stride + 1
    xp = jnp.pad(x, ((0, 0), (0, 0), (1, 1), (1, 1)))
    taps = []
    for dy in range(3):
        for dx in range(3):
            sl = xp[:, :, dy:dy + stride * (Ho - 1) + 1:stride,
                       dx:dx + stride * (Wo - 1) + 1:stride]
            taps.append(sl.reshape(C, N * Ho * Wo))
    return jnp.concatenate(taps, axis=0).astype(_MXU_DTYPE)


def _interp_idx(n_out, n_in):
    if n_out == 1:
        src = np.zeros((1,), np.float64)
    else:
        src = np.arange(n_out, dtype=np.float64) * (n_in - 1) / (n_out - 1)
    i0 = np.clip(np.floor(src).astype(np.int64), 0, n_in - 1)
    i1 = np.clip(i0 + 1, 0, n_in - 1)
    f = (src - i0).astype(np.float32)
    return jnp.asarray(i0), jnp.asarray(i1), jnp.asarray(f)


def _bilinear_ac(x, out_h, out_w):
    """F.interpolate(mode='bilinear', align_corners=True) as 2-tap gather+lerp.
    x: (C, N, H, W) channel-major."""
    _, _, H, W = x.shape
    h0, h1, fh = _interp_idx(out_h, H)
    w0, w1, fw = _interp_idx(out_w, W)
    fh = fh[None, None, :, None]
    fw = fw[None, None, None, :]
    xh = x[:, :, h0, :] * (1.0 - fh) + x[:, :, h1, :] * fh
    return xh[:, :, :, w0] * (1.0 - fw) + xh[:, :, :, w1] * fw


# ---------------------------------------------------------------------------
# One fused conv3x3 + bias + BatchNorm(batch stats) + ReLU (+ skip) layer
# ---------------------------------------------------------------------------
def conv_bn_relu(x_cm, layer, *, stride=1, skip=None):
    """x_cm: (Cin, N, H, W) f32 channel-major; skip: (Cout, N, Ho, Wo) or None.
    Returns (Cout, N, Ho, Wo) f32."""
    w2, cb, gamma, beta = layer          # (Cout,9Cin) bf16, 3x (Cout,1) f32
    cout = w2.shape[0]
    C, N, H, W = x_cm.shape
    Ho = (H + 2 - 3) // stride + 1
    Wo = (W + 2 - 3) // stride + 1
    M = N * Ho * Wo
    K = 9 * C
    TM, M_pad = _tile_m(M)
    n_pad = M_pad - M
    n_tiles = M_pad // TM
    grid = (n_tiles,)

    patches = _im2col_cm(x_cm, stride)                     # (K, M) bf16
    if n_pad:
        patches = jnp.pad(patches, ((0, 0), (0, n_pad)))   # zero lanes -> z=bias

    tiled = lambda rows: pl.BlockSpec((rows, TM), lambda m: (0, m))   # M-tiled
    full2 = lambda r, c: pl.BlockSpec((r, c), lambda m: (0, 0))       # resident
    stat_spec = pl.BlockSpec((1, cout, 1), lambda m: (m, 0, 0))       # per-tile

    # --- pass 1: conv + bias, per-tile channel sum / sumsq ('parallel') -----
    z, tsum, tssq = pl.pallas_call(
        _conv_stats_kernel,
        grid=grid,
        in_specs=[tiled(K), full2(cout, K), full2(cout, 1)],
        out_specs=(tiled(cout), stat_spec, stat_spec),
        out_shape=(jax.ShapeDtypeStruct((cout, M_pad), _Z_DTYPE),
                   jax.ShapeDtypeStruct((n_tiles, cout, 1), jnp.float32),
                   jax.ShapeDtypeStruct((n_tiles, cout, 1), jnp.float32)),
        compiler_params=_mosaic_params(("parallel",)),
    )(patches, w2, cb)

    # --- tiny per-channel stats -> folded affine (negligible JAX glue) ------
    s1 = jnp.sum(tsum, axis=0)                 # (Cout, 1)
    s2 = jnp.sum(tssq, axis=0)
    if n_pad:
        # Padded lanes have patches == 0, so their z is exactly the bias:
        # remove that exact contribution before computing batch statistics.
        s1 = s1 - n_pad * cb
        s2 = s2 - n_pad * (cb * cb)
    mean = s1 / M
    # TODO(synk): E[x^2]-E[x]^2 in f32 can cancel when |mean| >> std; switch to
    # per-tile mean + M2 (Chan merge) if that regime matters.
    var = jnp.maximum(s2 / M - mean * mean, 0.0)
    scale = gamma * jax.lax.rsqrt(var + _BN_EPS)
    shift = beta - mean * scale

    # --- pass 2: normalize + ReLU (+ fused residual), megacore-shardable ----
    if skip is None:
        kernel = _bn_relu_kernel
        args = (z, scale, shift)
        in_specs = [tiled(cout), full2(cout, 1), full2(cout, 1)]
    else:
        skip_flat = skip.reshape(cout, M)
        if n_pad:
            skip_flat = jnp.pad(skip_flat, ((0, 0), (0, n_pad)))
        kernel = _bn_relu_skip_kernel
        args = (z, scale, shift, skip_flat)
        in_specs = [tiled(cout), full2(cout, 1), full2(cout, 1), tiled(cout)]

    out = pl.pallas_call(
        kernel,
        grid=grid,
        in_specs=in_specs,
        out_specs=tiled(cout),
        out_shape=jax.ShapeDtypeStruct((cout, M_pad), jnp.float32),
        compiler_params=_mosaic_params(("parallel",)),
    )(*args)
    if n_pad:
        out = out[:, :M]
    return out.reshape(cout, N, Ho, Wo)


# ---------------------------------------------------------------------------
# LocalBlock forward (NCHW boundary, channel-major internally)
# ---------------------------------------------------------------------------
def local_block_forward(x_nchw, params):
    x = x_nchw.astype(jnp.float32)
    N, Cin, H, W = x.shape
    xc = jnp.transpose(x, (1, 0, 2, 3))            # (Cin, N, H, W)

    x0 = conv_bn_relu(xc, params['conv1'], stride=1)
    x1 = conv_bn_relu(xc, params['conv_down1'], stride=2)
    x1c = conv_bn_relu(x1, params['conv2'], stride=1)
    x2 = conv_bn_relu(x1, params['conv_down2'], stride=2)
    x2c = conv_bn_relu(x2, params['conv3'], stride=1)
    x3 = conv_bn_relu(x2, params['conv_down3'], stride=2)
    x3c = conv_bn_relu(x3, params['conv4'], stride=1)

    up3 = _bilinear_ac(x3c, x2c.shape[2], x2c.shape[3])
    x5 = conv_bn_relu(x2c + up3, params['conv5'], stride=1)

    up5 = _bilinear_ac(x5, x1c.shape[2], x1c.shape[3])
    x6 = conv_bn_relu(x1c + up5, params['conv6'], stride=1)

    up6 = _bilinear_ac(x6, H, W)
    # conv7 + bn7 + relu + residual "x + x7" fused (skip added inside pass 2).
    out = conv_bn_relu(x0 + up6, params['conv7'], stride=1, skip=xc)

    return jnp.transpose(out, (1, 0, 2, 3))        # back to NCHW


# ---------------------------------------------------------------------------
# Deterministic parameter init (shapes from nn.Conv2d / nn.BatchNorm2d)
# ---------------------------------------------------------------------------
def _init_layer(key, c_in, c_out):
    k1, k2, k3, k4 = jax.random.split(key, 4)
    bound = 1.0 / np.sqrt(c_in * 9)
    w = jax.random.uniform(k1, (3, 3, c_in, c_out), jnp.float32, -bound, bound)
    # Pack HWIO -> (Cout, 9*Cin), tap-major / channel-minor, bf16 MXU operand.
    w2 = jnp.transpose(w, (3, 0, 1, 2)).reshape(c_out, 9 * c_in).astype(_MXU_DTYPE)
    cb = jax.random.uniform(k2, (c_out, 1), jnp.float32, -bound, bound)
    gamma = 1.0 + 0.1 * jax.random.normal(k3, (c_out, 1), jnp.float32)
    beta = 0.1 * jax.random.normal(k4, (c_out, 1), jnp.float32)
    return (w2, cb, gamma, beta)


if __name__ == "__main__":
    in_channel, C = 4, 8
    key = jax.random.PRNGKey(0)
    kx, kp = jax.random.split(key)

    x = jax.random.normal(kx, (2, in_channel, 16, 16), jnp.float32)

    layer_defs = [
        ('conv1', in_channel, C), ('conv_down1', in_channel, C),
        ('conv2', C, C), ('conv_down2', C, C),
        ('conv3', C, C), ('conv_down3', C, C),
        ('conv4', C, C), ('conv5', C, C),
        ('conv6', C, C), ('conv7', C, in_channel),
    ]
    lkeys = jax.random.split(kp, len(layer_defs))
    params = {name: _init_layer(k, ci, co)
              for (name, ci, co), k in zip(layer_defs, lkeys)}

    fwd = jax.jit(functools.partial(local_block_forward, params=params))
    y = fwd(x)
    jax.block_until_ready(y)
    assert y.shape == x.shape and y.dtype == jnp.float32
    assert bool(jnp.all(jnp.isfinite(y)))
    print("KERNEL_OK")
</pallas_src>

<mosaic_0001>
module attributes {stable_mosaic.version = 11 : i64} {
  func.func @_conv_stats_kernel(%arg0: i32, %arg1: memref<36x128xbf16, #tpu.memory_space<vmem>>, %arg2: memref<8x36xbf16, #tpu.memory_space<vmem>>, %arg3: memref<8x1xf32, #tpu.memory_space<vmem>>, %arg4: memref<8x128xbf16, #tpu.memory_space<vmem>>, %arg5: memref<1x8x1xf32, #tpu.memory_space<vmem>>, %arg6: memref<1x8x1xf32, #tpu.memory_space<vmem>>) attributes {dimension_semantics = [#tpu.dimension_semantics<parallel>], iteration_bounds = array<i64: 1>, scalar_prefetch = 0 : i64, scratch_operands = 0 : i64, tpu.core_type = #tpu.core_type<tc>, window_params = [{transform_indices = @transform_0, window_bounds = array<i64: 36, 128>}, {pipeline_mode = #tpu.pipeline_mode<synchronous>, transform_indices = @transform_1, window_bounds = array<i64: 8, 36>}, {pipeline_mode = #tpu.pipeline_mode<synchronous>, transform_indices = @transform_2, window_bounds = array<i64: 8, 1>}, {transform_indices = @transform_3, window_bounds = array<i64: 8, 128>}, {transform_indices = @transform_4, window_bounds = array<i64: 1, 8, 1>}, {transform_indices = @transform_5, window_bounds = array<i64: 1, 8, 1>}]} {
    %c0 = arith.constant 0 : index
    %c0_0 = arith.constant 0 : index
    %0 = vector.load %arg2[%c0, %c0_0] : memref<8x36xbf16, #tpu.memory_space<vmem>>, vector<8x36xbf16>
    %c0_1 = arith.constant 0 : index
    %c0_2 = arith.constant 0 : index
    %1 = vector.load %arg1[%c0_1, %c0_2] : memref<36x128xbf16, #tpu.memory_space<vmem>>, vector<36x128xbf16>
    %cst = arith.constant dense<0.000000e+00> : vector<8x128xf32>
    %2 = tpu.matmul %0, %1, %cst {dimension_numbers = #tpu.dot_dimension_numbers<[1], [0], [0], [1], [0, 0, 1, 1], [], []>} : vector<8x36xbf16>, vector<36x128xbf16>, vector<8x128xf32> -> vector<8x128xf32>
    %c0_3 = arith.constant 0 : index
    %c0_4 = arith.constant 0 : index
    %3 = vector.load %arg3[%c0_3, %c0_4] : memref<8x1xf32, #tpu.memory_space<vmem>>, vector<8x1xf32>
    %4 = vector.broadcast %3 : vector<8x1xf32> to vector<8x128xf32>
    %5 = arith.addf %2, %4 : vector<8x128xf32>
    %cst_5 = arith.constant dense<0.000000e+00> : vector<8xf32>
    %6 = vector.multi_reduction <add>, %5, %cst_5 [1] : vector<8x128xf32> to vector<8xf32>
    %7 = vector.shape_cast %6 : vector<8xf32> to vector<8x1xf32>
    %8 = vector.shape_cast %7 : vector<8x1xf32> to vector<1x8x1xf32>
    %c0_6 = arith.constant 0 : index
    %c0_7 = arith.constant 0 : index
    %c0_8 = arith.constant 0 : index
    %9 = vector.load %arg5[%c0_6, %c0_7, %c0_8] : memref<1x8x1xf32, #tpu.memory_space<vmem>>, vector<1x8x1xf32>
    tpu.vector_store %arg5[%c0_6, %c0_7, %c0_8], %8 {strides = array<i32>} : memref<1x8x1xf32, #tpu.memory_space<vmem>>, vector<1x8x1xf32>,
    %10 = arith.mulf %5, %5 : vector<8x128xf32>
    %cst_9 = arith.constant dense<0.000000e+00> : vector<8xf32>
    %11 = vector.multi_reduction <add>, %10, %cst_9 [1] : vector<8x128xf32> to vector<8xf32>
    %12 = vector.shape_cast %11 : vector<8xf32> to vector<8x1xf32>
    %13 = vector.shape_cast %12 : vector<8x1xf32> to vector<1x8x1xf32>
    %c0_10 = arith.constant 0 : index
    %c0_11 = arith.constant 0 : index
    %c0_12 = arith.constant 0 : index
    %14 = vector.load %arg6[%c0_10, %c0_11, %c0_12] : memref<1x8x1xf32, #tpu.memory_space<vmem>>, vector<1x8x1xf32>
    tpu.vector_store %arg6[%c0_10, %c0_11, %c0_12], %13 {strides = array<i32>} : memref<1x8x1xf32, #tpu.memory_space<vmem>>, vector<1x8x1xf32>,
    %15 = arith.truncf %5 : vector<8x128xf32> to vector<8x128xbf16>
    %c0_13 = arith.constant 0 : index
    %c0_14 = arith.constant 0 : index
    %16 = vector.load %arg4[%c0_13, %c0_14] : memref<8x128xbf16, #tpu.memory_space<vmem>>, vector<8x128xbf16>
    tpu.vector_store %arg4[%c0_13, %c0_14], %15 {strides = array<i32>} : memref<8x128xbf16, #tpu.memory_space<vmem>>, vector<8x128xbf16>,
    return
  }
  func.func @transform_0(%arg0: i32) -> (i32, i32) {
    %c0_i32 = arith.constant 0 : i32
    %c0_i32_0 = arith.constant 0 : i32
    return %c0_i32, %arg0 : i32, i32
  }
  func.func @transform_1(%arg0: i32) -> (i32, i32) {
    %c0_i32 = arith.constant 0 : i32
    %c0_i32_0 = arith.constant 0 : i32
    %c0_i32_1 = arith.constant 0 : i32
    return %c0_i32, %c0_i32_0 : i32, i32
  }
  func.func @transform_2(%arg0: i32) -> (i32, i32) {
    %c0_i32 = arith.constant 0 : i32
    %c0_i32_0 = arith.constant 0 : i32
    %c0_i32_1 = arith.constant 0 : i32
    return %c0_i32, %c0_i32_0 : i32, i32
  }
  func.func @transform_3(%arg0: i32) -> (i32, i32) {
    %c0_i32 = arith.constant 0 : i32
    %c0_i32_0 = arith.constant 0 : i32
    return %c0_i32, %arg0 : i32, i32
  }
  func.func @transform_4(%arg0: i32) -> (i32, i32, i32) {
    %c0_i32 = arith.constant 0 : i32
    %c0_i32_0 = arith.constant 0 : i32
    %c0_i32_1 = arith.constant 0 : i32
    return %arg0, %c0_i32, %c0_i32_0 : i32, i32, i32
  }
  func.func @transform_5(%arg0: i32) -> (i32, i32, i32) {
    %c0_i32 = arith.constant 0 : i32
    %c0_i32_0 = arith.constant 0 : i32
    %c0_i32_1 = arith.constant 0 : i32
    return %arg0, %c0_i32, %c0_i32_0 : i32, i32, i32
  }
}

module attributes {stable_mosaic.version = 11 : i64} {
  func.func @_bn_relu_kernel(%arg0: i32, %arg1: memref<8x128xbf16, #tpu.memory_space<vmem>>, %arg2: memref<8x1xf32, #tpu.memory_space<vmem>>, %arg3: memref<8x1xf32, #tpu.memory_space<vmem>>, %arg4: memref<8x128xf32, #tpu.memory_space<vmem>>) attributes {dimension_semantics = [#tpu.dimension_semantics<parallel>], iteration_bounds = array<i64: 1>, scalar_prefetch = 0 : i64, scratch_operands = 0 : i64, tpu.core_type = #tpu.core_type<tc>, window_params = [{transform_indices = @transform_0, window_bounds = array<i64: 8, 128>}, {pipeline_mode = #tpu.pipeline_mode<synchronous>, transform_indices = @transform_1, window_bounds = array<i64: 8, 1>}, {pipeline_mode = #tpu.pipeline_mode<synchronous>, transform_indices = @transform_2, window_bounds = array<i64: 8, 1>}, {transform_indices = @transform_3, window_bounds = array<i64: 8, 128>}]} {
    %c0 = arith.constant 0 : index
    %c0_0 = arith.constant 0 : index
    %0 = vector.load %arg1[%c0, %c0_0] : memref<8x128xbf16, #tpu.memory_space<vmem>>, vector<8x128xbf16>
    %1 = arith.extf %0 : vector<8x128xbf16> to vector<8x128xf32>
    %c0_1 = arith.constant 0 : index
    %c0_2 = arith.constant 0 : index
    %2 = vector.load %arg2[%c0_1, %c0_2] : memref<8x1xf32, #tpu.memory_space<vmem>>, vector<8x1xf32>
    %3 = vector.broadcast %2 : vector<8x1xf32> to vector<8x128xf32>
    %4 = arith.mulf %1, %3 : vector<8x128xf32>
    %c0_3 = arith.constant 0 : index
    %c0_4 = arith.constant 0 : index
    %5 = vector.load %arg3[%c0_3, %c0_4] : memref<8x1xf32, #tpu.memory_space<vmem>>, vector<8x1xf32>
    %6 = vector.broadcast %5 : vector<8x1xf32> to vector<8x128xf32>
    %7 = arith.addf %4, %6 : vector<8x128xf32>
    %cst = arith.constant 0.000000e+00 : f32
    %8 = vector.broadcast %cst : f32 to vector<8x128xf32>
    %9 = arith.maximumf %7, %8 : vector<8x128xf32>
    %c0_5 = arith.constant 0 : index
    %c0_6 = arith.constant 0 : index
    %10 = vector.load %arg4[%c0_5, %c0_6] : memref<8x128xf32, #tpu.memory_space<vmem>>, vector<8x128xf32>
    tpu.vector_store %arg4[%c0_5, %c0_6], %9 {strides = array<i32>} : memref<8x128xf32, #tpu.memory_space<vmem>>, vector<8x128xf32>,
    return
  }
  func.func @transform_0(%arg0: i32) -> (i32, i32) {
    %c0_i32 = arith.constant 0 : i32
    %c0_i32_0 = arith.constant 0 : i32
    return %c0_i32, %arg0 : i32, i32
  }
  func.func @transform_1(%arg0: i32) -> (i32, i32) {
    %c0_i32 = arith.constant 0 : i32
    %c0_i32_0 = arith.constant 0 : i32
    %c0_i32_1 = arith.constant 0 : i32
    return %c0_i32, %c0_i32_0 : i32, i32
  }
  func.func @transform_2(%arg0: i32) -> (i32, i32) {
    %c0_i32 = arith.constant 0 : i32
    %c0_i32_0 = arith.constant 0 : i32
    %c0_i32_1 = arith.constant 0 : i32
    return %c0_i32, %c0_i32_0 : i32, i32
  }
  func.func @transform_3(%arg0: i32) -> (i32, i32) {
    %c0_i32 = arith.constant 0 : i32
    %c0_i32_0 = arith.constant 0 : i32
    return %c0_i32, %arg0 : i32, i32
  }
}

module attributes {stable_mosaic.version = 11 : i64} {
  func.func @_conv_stats_kernel(%arg0: i32, %arg1: memref<72x128xbf16, #tpu.memory_space<vmem>>, %arg2: memref<8x72xbf16, #tpu.memory_space<vmem>>, %arg3: memref<8x1xf32, #tpu.memory_space<vmem>>, %arg4: memref<8x128xbf16, #tpu.memory_space<vmem>>, %arg5: memref<1x8x1xf32, #tpu.memory_space<vmem>>, %arg6: memref<1x8x1xf32, #tpu.memory_space<vmem>>) attributes {dimension_semantics = [#tpu.dimension_semantics<parallel>], iteration_bounds = array<i64: 1>, scalar_prefetch = 0 : i64, scratch_operands = 0 : i64, tpu.core_type = #tpu.core_type<tc>, window_params = [{transform_indices = @transform_0, window_bounds = array<i64: 72, 128>}, {pipeline_mode = #tpu.pipeline_mode<synchronous>, transform_indices = @transform_1, window_bounds = array<i64: 8, 72>}, {pipeline_mode = #tpu.pipeline_mode<synchronous>, transform_indices = @transform_2, window_bounds = array<i64: 8, 1>}, {transform_indices = @transform_3, window_bounds = array<i64: 8, 128>}, {transform_indices = @transform_4, window_bounds = array<i64: 1, 8, 1>}, {transform_indices = @transform_5, window_bounds = array<i64: 1, 8, 1>}]} {
    %c0 = arith.constant 0 : index
    %c0_0 = arith.constant 0 : index
    %0 = vector.load %arg2[%c0, %c0_0] : memref<8x72xbf16, #tpu.memory_space<vmem>>, vector<8x72xbf16>
    %c0_1 = arith.constant 0 : index
    %c0_2 = arith.constant 0 : index
    %1 = vector.load %arg1[%c0_1, %c0_2] : memref<72x128xbf16, #tpu.memory_space<vmem>>, vector<72x128xbf16>
    %cst = arith.constant dense<0.000000e+00> : vector<8x128xf32>
    %2 = tpu.matmul %0, %1, %cst {dimension_numbers = #tpu.dot_dimension_numbers<[1], [0], [0], [1], [0, 0, 1, 1], [], []>} : vector<8x72xbf16>, vector<72x128xbf16>, vector<8x128xf32> -> vector<8x128xf32>
    %c0_3 = arith.constant 0 : index
    %c0_4 = arith.constant 0 : index
    %3 = vector.load %arg3[%c0_3, %c0_4] : memref<8x1xf32, #tpu.memory_space<vmem>>, vector<8x1xf32>
    %4 = vector.broadcast %3 : vector<8x1xf32> to vector<8x128xf32>
    %5 = arith.addf %2, %4 : vector<8x128xf32>
    %cst_5 = arith.constant dense<0.000000e+00> : vector<8xf32>
    %6 = vector.multi_reduction <add>, %5, %cst_5 [1] : vector<8x128xf32> to vector<8xf32>
    %7 = vector.shape_cast %6 : vector<8xf32> to vector<8x1xf32>
    %8 = vector.shape_cast %7 : vector<8x1xf32> to vector<1x8x1xf32>
    %c0_6 = arith.constant 0 : index
    %c0_7 = arith.constant 0 : index
    %c0_8 = arith.constant 0 : index
    %9 = vector.load %arg5[%c0_6, %c0_7, %c0_8] : memref<1x8x1xf32, #tpu.memory_space<vmem>>, vector<1x8x1xf32>
    tpu.vector_store %arg5[%c0_6, %c0_7, %c0_8], %8 {strides = array<i32>} : memref<1x8x1xf32, #tpu.memory_space<vmem>>, vector<1x8x1xf32>,
    %10 = arith.mulf %5, %5 : vector<8x128xf32>
    %cst_9 = arith.constant dense<0.000000e+00> : vector<8xf32>
    %11 = vector.multi_reduction <add>, %10, %cst_9 [1] : vector<8x128xf32> to vector<8xf32>
    %12 = vector.shape_cast %11 : vector<8xf32> to vector<8x1xf32>
    %13 = vector.shape_cast %12 : vector<8x1xf32> to vector<1x8x1xf32>
    %c0_10 = arith.constant 0 : index
    %c0_11 = arith.constant 0 : index
    %c0_12 = arith.constant 0 : index
    %14 = vector.load %arg6[%c0_10, %c0_11, %c0_12] : memref<1x8x1xf32, #tpu.memory_space<vmem>>, vector<1x8x1xf32>
    tpu.vector_store %arg6[%c0_10, %c0_11, %c0_12], %13 {strides = array<i32>} : memref<1x8x1xf32, #tpu.memory_space<vmem>>, vector<1x8x1xf32>,
    %15 = arith.truncf %5 : vector<8x128xf32> to vector<8x128xbf16>
    %c0_13 = arith.constant 0 : index
    %c0_14 = arith.constant 0 : index
    %16 = vector.load %arg4[%c0_13, %c0_14] : memref<8x128xbf16, #tpu.memory_space<vmem>>, vector<8x128xbf16>
    tpu.vector_store %arg4[%c0_13, %c0_14], %15 {strides = array<i32>} : memref<8x128xbf16, #tpu.memory_space<vmem>>, vector<8x128xbf16>,
    return
  }
  func.func @transform_0(%arg0: i32) -> (i32, i32) {
    %c0_i32 = arith.constant 0 : i32
    %c0_i32_0 = arith.constant 0 : i32
    return %c0_i32, %arg0 : i32, i32
  }
  func.func @transform_1(%arg0: i32) -> (i32, i32) {
    %c0_i32 = arith.constant 0 : i32
    %c0_i32_0 = arith.constant 0 : i32
    %c0_i32_1 = arith.constant 0 : i32
    return %c0_i32, %c0_i32_0 : i32, i32
  }
  func.func @transform_2(%arg0: i32) -> (i32, i32) {
    %c0_i32 = arith.constant 0 : i32
    %c0_i32_0 = arith.constant 0 : i32
    %c0_i32_1 = arith.constant 0 : i32
    return %c0_i32, %c0_i32_0 : i32, i32
  }
  func.func @transform_3(%arg0: i32) -> (i32, i32) {
    %c0_i32 = arith.constant 0 : i32
    %c0_i32_0 = arith.constant 0 : i32
    return %c0_i32, %arg0 : i32, i32
  }
  func.func @transform_4(%arg0: i32) -> (i32, i32, i32) {
    %c0_i32 = arith.constant 0 : i32
    %c0_i32_0 = arith.constant 0 : i32
    %c0_i32_1 = arith.constant 0 : i32
    return %arg0, %c0_i32, %c0_i32_0 : i32, i32, i32
  }
  func.func @transform_5(%arg0: i32) -> (i32, i32, i32) {
    %c0_i32 = arith.constant 0 : i32
    %c0_i32_0 = arith.constant 0 : i32
    %c0_i32_1 = arith.constant 0 : i32
    return %arg0, %c0_i32, %c0_i32_0 : i32, i32, i32
  }
}

module attributes {stable_mosaic.version = 11 : i64} {
  func.func @_conv_stats_kernel(%arg0: i32, %arg1: memref<36x512xbf16, #tpu.memory_space<vmem>>, %arg2: memref<8x36xbf16, #tpu.memory_space<vmem>>, %arg3: memref<8x1xf32, #tpu.memory_space<vmem>>, %arg4: memref<8x512xbf16, #tpu.memory_space<vmem>>, %arg5: memref<1x8x1xf32, #tpu.memory_space<vmem>>, %arg6: memref<1x8x1xf32, #tpu.memory_space<vmem>>) attributes {dimension_semantics = [#tpu.dimension_semantics<parallel>], iteration_bounds = array<i64: 1>, scalar_prefetch = 0 : i64, scratch_operands = 0 : i64, tpu.core_type = #tpu.core_type<tc>, window_params = [{transform_indices = @transform_0, window_bounds = array<i64: 36, 512>}, {pipeline_mode = #tpu.pipeline_mode<synchronous>, transform_indices = @transform_1, window_bounds = array<i64: 8, 36>}, {pipeline_mode = #tpu.pipeline_mode<synchronous>, transform_indices = @transform_2, window_bounds = array<i64: 8, 1>}, {transform_indices = @transform_3, window_bounds = array<i64: 8, 512>}, {transform_indices = @transform_4, window_bounds = array<i64: 1, 8, 1>}, {transform_indices = @transform_5, window_bounds = array<i64: 1, 8, 1>}]} {
    %c0 = arith.constant 0 : index
    %c0_0 = arith.constant 0 : index
    %0 = vector.load %arg2[%c0, %c0_0] : memref<8x36xbf16, #tpu.memory_space<vmem>>, vector<8x36xbf16>
    %c0_1 = arith.constant 0 : index
    %c0_2 = arith.constant 0 : index
    %1 = vector.load %arg1[%c0_1, %c0_2] : memref<36x512xbf16, #tpu.memory_space<vmem>>, vector<36x512xbf16>
    %cst = arith.constant dense<0.000000e+00> : vector<8x512xf32>
    %2 = tpu.matmul %0, %1, %cst {dimension_numbers = #tpu.dot_dimension_numbers<[1], [0], [0], [1], [0, 0, 1, 1], [], []>} : vector<8x36xbf16>, vector<36x512xbf16>, vector<8x512xf32> -> vector<8x512xf32>
    %c0_3 = arith.constant 0 : index
    %c0_4 = arith.constant 0 : index
    %3 = vector.load %arg3[%c0_3, %c0_4] : memref<8x1xf32, #tpu.memory_space<vmem>>, vector<8x1xf32>
    %4 = vector.broadcast %3 : vector<8x1xf32> to vector<8x512xf32>
    %5 = arith.addf %2, %4 : vector<8x512xf32>
    %cst_5 = arith.constant dense<0.000000e+00> : vector<8xf32>
    %6 = vector.multi_reduction <add>, %5, %cst_5 [1] : vector<8x512xf32> to vector<8xf32>
    %7 = vector.shape_cast %6 : vector<8xf32> to vector<8x1xf32>
    %8 = vector.shape_cast %7 : vector<8x1xf32> to vector<1x8x1xf32>
    %c0_6 = arith.constant 0 : index
    %c0_7 = arith.constant 0 : index
    %c0_8 = arith.constant 0 : index
    %9 = vector.load %arg5[%c0_6, %c0_7, %c0_8] : memref<1x8x1xf32, #tpu.memory_space<vmem>>, vector<1x8x1xf32>
    tpu.vector_store %arg5[%c0_6, %c0_7, %c0_8], %8 {strides = array<i32>} : memref<1x8x1xf32, #tpu.memory_space<vmem>>, vector<1x8x1xf32>,
    %10 = arith.mulf %5, %5 : vector<8x512xf32>
    %cst_9 = arith.constant dense<0.000000e+00> : vector<8xf32>
    %11 = vector.multi_reduction <add>, %10, %cst_9 [1] : vector<8x512xf32> to vector<8xf32>
    %12 = vector.shape_cast %11 : vector<8xf32> to vector<8x1xf32>
    %13 = vector.shape_cast %12 : vector<8x1xf32> to vector<1x8x1xf32>
    %c0_10 = arith.constant 0 : index
    %c0_11 = arith.constant 0 : index
    %c0_12 = arith.constant 0 : index
    %14 = vector.load %arg6[%c0_10, %c0_11, %c0_12] : memref<1x8x1xf32, #tpu.memory_space<vmem>>, vector<1x8x1xf32>
    tpu.vector_store %arg6[%c0_10, %c0_11, %c0_12], %13 {strides = array<i32>} : memref<1x8x1xf32, #tpu.memory_space<vmem>>, vector<1x8x1xf32>,
    %15 = arith.truncf %5 : vector<8x512xf32> to vector<8x512xbf16>
    %c0_13 = arith.constant 0 : index
    %c0_14 = arith.constant 0 : index
    %16 = vector.load %arg4[%c0_13, %c0_14] : memref<8x512xbf16, #tpu.memory_space<vmem>>, vector<8x512xbf16>
    tpu.vector_store %arg4[%c0_13, %c0_14], %15 {strides = array<i32>} : memref<8x512xbf16, #tpu.memory_space<vmem>>, vector<8x512xbf16>,
    return
  }
  func.func @transform_0(%arg0: i32) -> (i32, i32) {
    %c0_i32 = arith.constant 0 : i32
    %c0_i32_0 = arith.constant 0 : i32
    return %c0_i32, %arg0 : i32, i32
  }
  func.func @transform_1(%arg0: i32) -> (i32, i32) {
    %c0_i32 = arith.constant 0 : i32
    %c0_i32_0 = arith.constant 0 : i32
    %c0_i32_1 = arith.constant 0 : i32
    return %c0_i32, %c0_i32_0 : i32, i32
  }
  func.func @transform_2(%arg0: i32) -> (i32, i32) {
    %c0_i32 = arith.constant 0 : i32
    %c0_i32_0 = arith.constant 0 : i32
    %c0_i32_1 = arith.constant 0 : i32
    return %c0_i32, %c0_i32_0 : i32, i32
  }
  func.func @transform_3(%arg0: i32) -> (i32, i32) {
    %c0_i32 = arith.constant 0 : i32
    %c0_i32_0 = arith.constant 0 : i32
    return %c0_i32, %arg0 : i32, i32
  }
  func.func @transform_4(%arg0: i32) -> (i32, i32, i32) {
    %c0_i32 = arith.constant 0 : i32
    %c0_i32_0 = arith.constant 0 : i32
    %c0_i32_1 = arith.constant 0 : i32
    return %arg0, %c0_i32, %c0_i32_0 : i32, i32, i32
  }
  func.func @transform_5(%arg0: i32) -> (i32, i32, i32) {
    %c0_i32 = arith.constant 0 : i32
    %c0_i32_0 = arith.constant 0 : i32
    %c0_i32_1 = arith.constant 0 : i32
    return %arg0, %c0_i32, %c0_i32_0 : i32, i32, i32
  }
}

module attributes {stable_mosaic.version = 11 : i64} {
  func.func @_bn_relu_kernel(%arg0: i32, %arg1: memref<8x512xbf16, #tpu.memory_space<vmem>>, %arg2: memref<8x1xf32, #tpu.memory_space<vmem>>, %arg3: memref<8x1xf32, #tpu.memory_space<vmem>>, %arg4: memref<8x512xf32, #tpu.memory_space<vmem>>) attributes {dimension_semantics = [#tpu.dimension_semantics<parallel>], iteration_bounds = array<i64: 1>, scalar_prefetch = 0 : i64, scratch_operands = 0 : i64, tpu.core_type = #tpu.core_type<tc>, window_params = [{transform_indices = @transform_0, window_bounds = array<i64: 8, 512>}, {pipeline_mode = #tpu.pipeline_mode<synchronous>, transform_indices = @transform_1, window_bounds = array<i64: 8, 1>}, {pipeline_mode = #tpu.pipeline_mode<synchronous>, transform_indices = @transform_2, window_bounds = array<i64: 8, 1>}, {transform_indices = @transform_3, window_bounds = array<i64: 8, 512>}]} {
    %c0 = arith.constant 0 : index
    %c0_0 = arith.constant 0 : index
    %0 = vector.load %arg1[%c0, %c0_0] : memref<8x512xbf16, #tpu.memory_space<vmem>>, vector<8x512xbf16>
    %1 = arith.extf %0 : vector<8x512xbf16> to vector<8x512xf32>
    %c0_1 = arith.constant 0 : index
    %c0_2 = arith.constant 0 : index
    %2 = vector.load %arg2[%c0_1, %c0_2] : memref<8x1xf32, #tpu.memory_space<vmem>>, vector<8x1xf32>
    %3 = vector.broadcast %2 : vector<8x1xf32> to vector<8x512xf32>
    %4 = arith.mulf %1, %3 : vector<8x512xf32>
    %c0_3 = arith.constant 0 : index
    %c0_4 = arith.constant 0 : index
    %5 = vector.load %arg3[%c0_3, %c0_4] : memref<8x1xf32, #tpu.memory_space<vmem>>, vector<8x1xf32>
    %6 = vector.broadcast %5 : vector<8x1xf32> to vector<8x512xf32>
    %7 = arith.addf %4, %6 : vector<8x512xf32>
    %cst = arith.constant 0.000000e+00 : f32
    %8 = vector.broadcast %cst : f32 to vector<8x512xf32>
    %9 = arith.maximumf %7, %8 : vector<8x512xf32>
    %c0_5 = arith.constant 0 : index
    %c0_6 = arith.constant 0 : index
    %10 = vector.load %arg4[%c0_5, %c0_6] : memref<8x512xf32, #tpu.memory_space<vmem>>, vector<8x512xf32>
    tpu.vector_store %arg4[%c0_5, %c0_6], %9 {strides = array<i32>} : memref<8x512xf32, #tpu.memory_space<vmem>>, vector<8x512xf32>,
    return
  }
  func.func @transform_0(%arg0: i32) -> (i32, i32) {
    %c0_i32 = arith.constant 0 : i32
    %c0_i32_0 = arith.constant 0 : i32
    return %c0_i32, %arg0 : i32, i32
  }
  func.func @transform_1(%arg0: i32) -> (i32, i32) {
    %c0_i32 = arith.constant 0 : i32
    %c0_i32_0 = arith.constant 0 : i32
    %c0_i32_1 = arith.constant 0 : i32
    return %c0_i32, %c0_i32_0 : i32, i32
  }
  func.func @transform_2(%arg0: i32) -> (i32, i32) {
    %c0_i32 = arith.constant 0 : i32
    %c0_i32_0 = arith.constant 0 : i32
    %c0_i32_1 = arith.constant 0 : i32
    return %c0_i32, %c0_i32_0 : i32, i32
  }
  func.func @transform_3(%arg0: i32) -> (i32, i32) {
    %c0_i32 = arith.constant 0 : i32
    %c0_i32_0 = arith.constant 0 : i32
    return %c0_i32, %arg0 : i32, i32
  }
}

module attributes {stable_mosaic.version = 11 : i64} {
  func.func @_conv_stats_kernel(%arg0: i32, %arg1: memref<72x512xbf16, #tpu.memory_space<vmem>>, %arg2: memref<4x72xbf16, #tpu.memory_space<vmem>>, %arg3: memref<4x1xf32, #tpu.memory_space<vmem>>, %arg4: memref<4x512xbf16, #tpu.memory_space<vmem>>, %arg5: memref<1x4x1xf32, #tpu.memory_space<vmem>>, %arg6: memref<1x4x1xf32, #tpu.memory_space<vmem>>) attributes {dimension_semantics = [#tpu.dimension_semantics<parallel>], iteration_bounds = array<i64: 1>, scalar_prefetch = 0 : i64, scratch_operands = 0 : i64, tpu.core_type = #tpu.core_type<tc>, window_params = [{transform_indices = @transform_0, window_bounds = array<i64: 72, 512>}, {pipeline_mode = #tpu.pipeline_mode<synchronous>, transform_indices = @transform_1, window_bounds = array<i64: 4, 72>}, {pipeline_mode = #tpu.pipeline_mode<synchronous>, transform_indices = @transform_2, window_bounds = array<i64: 4, 1>}, {transform_indices = @transform_3, window_bounds = array<i64: 4, 512>}, {transform_indices = @transform_4, window_bounds = array<i64: 1, 4, 1>}, {transform_indices = @transform_5, window_bounds = array<i64: 1, 4, 1>}]} {
    %c0 = arith.constant 0 : index
    %c0_0 = arith.constant 0 : index
    %0 = vector.load %arg2[%c0, %c0_0] : memref<4x72xbf16, #tpu.memory_space<vmem>>, vector<4x72xbf16>
    %c0_1 = arith.constant 0 : index
    %c0_2 = arith.constant 0 : index
    %1 = vector.load %arg1[%c0_1, %c0_2] : memref<72x512xbf16, #tpu.memory_space<vmem>>, vector<72x512xbf16>
    %cst = arith.constant dense<0.000000e+00> : vector<4x512xf32>
    %2 = tpu.matmul %0, %1, %cst {dimension_numbers = #tpu.dot_dimension_numbers<[1], [0], [0], [1], [0, 0, 1, 1], [], []>} : vector<4x72xbf16>, vector<72x512xbf16>, vector<4x512xf32> -> vector<4x512xf32>
    %c0_3 = arith.constant 0 : index
    %c0_4 = arith.constant 0 : index
    %3 = vector.load %arg3[%c0_3, %c0_4] : memref<4x1xf32, #tpu.memory_space<vmem>>, vector<4x1xf32>
    %4 = vector.broadcast %3 : vector<4x1xf32> to vector<4x512xf32>
    %5 = arith.addf %2, %4 : vector<4x512xf32>
    %cst_5 = arith.constant dense<0.000000e+00> : vector<4xf32>
    %6 = vector.multi_reduction <add>, %5, %cst_5 [1] : vector<4x512xf32> to vector<4xf32>
    %7 = vector.shape_cast %6 : vector<4xf32> to vector<4x1xf32>
    %8 = vector.shape_cast %7 : vector<4x1xf32> to vector<1x4x1xf32>
    %c0_6 = arith.constant 0 : index
    %c0_7 = arith.constant 0 : index
    %c0_8 = arith.constant 0 : index
    %9 = vector.load %arg5[%c0_6, %c0_7, %c0_8] : memref<1x4x1xf32, #tpu.memory_space<vmem>>, vector<1x4x1xf32>
    tpu.vector_store %arg5[%c0_6, %c0_7, %c0_8], %8 {strides = array<i32>} : memref<1x4x1xf32, #tpu.memory_space<vmem>>, vector<1x4x1xf32>,
    %10 = arith.mulf %5, %5 : vector<4x512xf32>
    %cst_9 = arith.constant dense<0.000000e+00> : vector<4xf32>
    %11 = vector.multi_reduction <add>, %10, %cst_9 [1] : vector<4x512xf32> to vector<4xf32>
    %12 = vector.shape_cast %11 : vector<4xf32> to vector<4x1xf32>
    %13 = vector.shape_cast %12 : vector<4x1xf32> to vector<1x4x1xf32>
    %c0_10 = arith.constant 0 : index
    %c0_11 = arith.constant 0 : index
    %c0_12 = arith.constant 0 : index
    %14 = vector.load %arg6[%c0_10, %c0_11, %c0_12] : memref<1x4x1xf32, #tpu.memory_space<vmem>>, vector<1x4x1xf32>
    tpu.vector_store %arg6[%c0_10, %c0_11, %c0_12], %13 {strides = array<i32>} : memref<1x4x1xf32, #tpu.memory_space<vmem>>, vector<1x4x1xf32>,
    %15 = arith.truncf %5 : vector<4x512xf32> to vector<4x512xbf16>
    %c0_13 = arith.constant 0 : index
    %c0_14 = arith.constant 0 : index
    %16 = vector.load %arg4[%c0_13, %c0_14] : memref<4x512xbf16, #tpu.memory_space<vmem>>, vector<4x512xbf16>
    tpu.vector_store %arg4[%c0_13, %c0_14], %15 {strides = array<i32>} : memref<4x512xbf16, #tpu.memory_space<vmem>>, vector<4x512xbf16>,
    return
  }
  func.func @transform_0(%arg0: i32) -> (i32, i32) {
    %c0_i32 = arith.constant 0 : i32
    %c0_i32_0 = arith.constant 0 : i32
    return %c0_i32, %arg0 : i32, i32
  }
  func.func @transform_1(%arg0: i32) -> (i32, i32) {
    %c0_i32 = arith.constant 0 : i32
    %c0_i32_0 = arith.constant 0 : i32
    %c0_i32_1 = arith.constant 0 : i32
    return %c0_i32, %c0_i32_0 : i32, i32
  }
  func.func @transform_2(%arg0: i32) -> (i32, i32) {
    %c0_i32 = arith.constant 0 : i32
    %c0_i32_0 = arith.constant 0 : i32
    %c0_i32_1 = arith.constant 0 : i32
    return %c0_i32, %c0_i32_0 : i32, i32
  }
  func.func @transform_3(%arg0: i32) -> (i32, i32) {
    %c0_i32 = arith.constant 0 : i32
    %c0_i32_0 = arith.constant 0 : i32
    return %c0_i32, %arg0 : i32, i32
  }
  func.func @transform_4(%arg0: i32) -> (i32, i32, i32) {
    %c0_i32 = arith.constant 0 : i32
    %c0_i32_0 = arith.constant 0 : i32
    %c0_i32_1 = arith.constant 0 : i32
    return %arg0, %c0_i32, %c0_i32_0 : i32, i32, i32
  }
  func.func @transform_5(%arg0: i32) -> (i32, i32, i32) {
    %c0_i32 = arith.constant 0 : i32
    %c0_i32_0 = arith.constant 0 : i32
    %c0_i32_1 = arith.constant 0 : i32
    return %arg0, %c0_i32, %c0_i32_0 : i32, i32, i32
  }
}

module attributes {stable_mosaic.version = 11 : i64} {
  func.func @_bn_relu_skip_kernel(%arg0: i32, %arg1: memref<4x512xbf16, #tpu.memory_space<vmem>>, %arg2: memref<4x1xf32, #tpu.memory_space<vmem>>, %arg3: memref<4x1xf32, #tpu.memory_space<vmem>>, %arg4: memref<4x512xf32, #tpu.memory_space<vmem>>, %arg5: memref<4x512xf32, #tpu.memory_space<vmem>>) attributes {dimension_semantics = [#tpu.dimension_semantics<parallel>], iteration_bounds = array<i64: 1>, scalar_prefetch = 0 : i64, scratch_operands = 0 : i64, tpu.core_type = #tpu.core_type<tc>, window_params = [{transform_indices = @transform_0, window_bounds = array<i64: 4, 512>}, {pipeline_mode = #tpu.pipeline_mode<synchronous>, transform_indices = @transform_1, window_bounds = array<i64: 4, 1>}, {pipeline_mode = #tpu.pipeline_mode<synchronous>, transform_indices = @transform_2, window_bounds = array<i64: 4, 1>}, {transform_indices = @transform_3, window_bounds = array<i64: 4, 512>}, {transform_indices = @transform_4, window_bounds = array<i64: 4, 512>}]} {
    %c0 = arith.constant 0 : index
    %c0_0 = arith.constant 0 : index
    %0 = vector.load %arg1[%c0, %c0_0] : memref<4x512xbf16, #tpu.memory_space<vmem>>, vector<4x512xbf16>
    %1 = arith.extf %0 : vector<4x512xbf16> to vector<4x512xf32>
    %c0_1 = arith.constant 0 : index
    %c0_2 = arith.constant 0 : index
    %2 = vector.load %arg2[%c0_1, %c0_2] : memref<4x1xf32, #tpu.memory_space<vmem>>, vector<4x1xf32>
    %3 = vector.broadcast %2 : vector<4x1xf32> to vector<4x512xf32>
    %4 = arith.mulf %1, %3 : vector<4x512xf32>
    %c0_3 = arith.constant 0 : index
    %c0_4 = arith.constant 0 : index
    %5 = vector.load %arg3[%c0_3, %c0_4] : memref<4x1xf32, #tpu.memory_space<vmem>>, vector<4x1xf32>
    %6 = vector.broadcast %5 : vector<4x1xf32> to vector<4x512xf32>
    %7 = arith.addf %4, %6 : vector<4x512xf32>
    %cst = arith.constant 0.000000e+00 : f32
    %8 = vector.broadcast %cst : f32 to vector<4x512xf32>
    %9 = arith.maximumf %7, %8 : vector<4x512xf32>
    %c0_5 = arith.constant 0 : index
    %c0_6 = arith.constant 0 : index
    %10 = vector.load %arg4[%c0_5, %c0_6] : memref<4x512xf32, #tpu.memory_space<vmem>>, vector<4x512xf32>
    %11 = arith.addf %9, %10 : vector<4x512xf32>
    %c0_7 = arith.constant 0 : index
    %c0_8 = arith.constant 0 : index
    %12 = vector.load %arg5[%c0_7, %c0_8] : memref<4x512xf32, #tpu.memory_space<vmem>>, vector<4x512xf32>
    tpu.vector_store %arg5[%c0_7, %c0_8], %11 {strides = array<i32>} : memref<4x512xf32, #tpu.memory_space<vmem>>, vector<4x512xf32>,
    return
  }
  func.func @transform_0(%arg0: i32) -> (i32, i32) {
    %c0_i32 = arith.constant 0 : i32
    %c0_i32_0 = arith.constant 0 : i32
    return %c0_i32, %arg0 : i32, i32
  }
  func.func @transform_1(%arg0: i32) -> (i32, i32) {
    %c0_i32 = arith.constant 0 : i32
    %c0_i32_0 = arith.constant 0 : i32
    %c0_i32_1 = arith.constant 0 : i32
    return %c0_i32, %c0_i32_0 : i32, i32
  }
  func.func @transform_2(%arg0: i32) -> (i32, i32) {
    %c0_i32 = arith.constant 0 : i32
    %c0_i32_0 = arith.constant 0 : i32
    %c0_i32_1 = arith.constant 0 : i32
    return %c0_i32, %c0_i32_0 : i32, i32
  }
  func.func @transform_3(%arg0: i32) -> (i32, i32) {
    %c0_i32 = arith.constant 0 : i32
    %c0_i32_0 = arith.constant 0 : i32
    return %c0_i32, %arg0 : i32, i32
  }
  func.func @transform_4(%arg0: i32) -> (i32, i32) {
    %c0_i32 = arith.constant 0 : i32
    %c0_i32_0 = arith.constant 0 : i32
    return %c0_i32, %arg0 : i32, i32
  }
}

</mosaic_0001>

<bundles_post_ra>
// kernel: local_block_forward.23
= control target key start
LH: loop header
LB: loop body
LE: loop exit
PB: predicated region body
PF: predicated region fallthrough
CT: control target
= control target key end

     0   :  { %v38_v0 = vmov 0   ;;  %s71_s1 = inlined_call_operand.vmem [shape: f32[8,1], index: 1, kind: input, shape index: {}]   ;;  %s72_s2 = inlined_call_operand.vmem [shape: f32[8,1], index: 2, kind: input, shape index: {}]   ;;  %s73_s0 = inlined_call_operand.vmem [shape: bf16[8,128], index: 0, kind: input, shape index: {}]   ;;  %s74_s3 = inlined_call_operand.vmem [shape: f32[8,128], index: 3, kind: output, shape index: {}]  }
   0x1   :  { %37 = vset.pattern.permute.xlu0 %v38_v0  ;;  %v16_v1 = vld [vmem:[%s71_s1] sm:$0xff] }
   0x2   :  { %19 = vperm.xlu0 %37, %v16_v1   ;;  %v23_v2 = vld [vmem:[%s72_s2] sm:$0xff] }
   0x3   :  { %v14_v4 = vld [vmem:[%s73_s0] sm:$0xf] }
   0x4   :  { %v15_v5 = vunpack.c.l.bf16 %v14_v4 }
   0xa   :  { %26 = vperm.xlu0 %37, %v23_v2  }
  0x74   :  { %v20_v3 = vpop.permute.xlu0 %19 }
  0x75   :  { %v22_v6 = vmul.f32 %v20_v3, %v15_v5 }
  0x7c   :  { %v27_v7 = vpop.permute.xlu0 %26 }
  0x7d   :  { %v29_v8 = vadd.f32 %v27_v7, %v22_v6 }
  0x7f   :  { %v30_v9 = vmax.f32 %v29_v8, 0.0 }
  0x81   :  { %31 = vst [vmem:[%s74_s3] sm:$0xff] %v30_v9 }

// kernel: local_block_forward.22
= control target key start
LH: loop header
LB: loop body
LE: loop exit
PB: predicated region body
PF: predicated region fallthrough
CT: control target
= control target key end

     0   :  { %v101_v1 = vmov 0   ;;  %vm49_vm0 = vcmask 1041408   ;;  %vm45_vm1 = vcmask 293888   ;;  %vm68_vm2 = vcmask 7168   ;;  %s156_s0 = inlined_call_operand.vmem [shape: bf16[36,128], index: 0, kind: input, shape index: {}]   ;;  %s157_s2 = inlined_call_operand.vmem [shape: f32[8,1], index: 2, kind: input, shape index: {}]   ;;  %s158_s1 = inlined_call_operand.vmem [shape: bf16[8,36], index: 1, kind: input, shape index: {}]   ;;  %s159_s3 = inlined_call_operand.vmem [shape: bf16[8,128], index: 3, kind: output, shape index: {0}]   ;;  %s160_s4 = inlined_call_operand.vmem [shape: f32[1,8,1], index: 4, kind: output, shape index: {1}]   ;;  %s161_s5 = inlined_call_operand.vmem [shape: f32[1,8,1], index: 5, kind: output, shape index: {2}]  }
   0x1   :  { %v23_v0 = vld [vmem:[%s156_s0 + $0x10] sm:$0x3]  ;;  %100 = vset.pattern.permute.xlu0 %v101_v1  ;;  %v24_v3 = vld [vmem:[%s157_s2] sm:$0xff]  ;;  %v98_v6 = vld [vmem:[%s156_s0 + $0x8] sm:$0xff] }
   0x2   :  { %v39_v2 = vunpack.c.l.b16 %v23_v0  ;;  %27 = vperm.xlu0 %100, %v24_v3   ;;  %v97_v7 = vld [vmem:[%s156_s0] sm:$0xff] }
   0x3   :  { %v18_v8 = vld [vmem:[%s158_s1] sm:$0xf] }
   0x4   :  { %v42_v4 = vpack.c.b16 %v39_v2, %v39_v2 }
   0x6   :  { %v51_v5 = vsel %vm49_vm0, %v42_v4, 0 }
   0x7   :  { %58 = vmatpush.bf16.msra.mxu0 %v51_v5 }
   0xb   :  { %59 = vmatpush.bf16.msra.mxu0 %v98_v6 }
   0xf   :  { %60 = vmatpush.bf16.msra.mxu0 %v97_v7 }
  0x12   :  { %96 = vmatmul.msk.bf16.vlgmr.msra.gmra.mxu0 %vm45_vm1, %v18_v8 }
  0x74   :  { %v28_v9 = vpop.permute.xlu0 %27 }
  0x8f   :  { %v62_v10 = vpop.f32.mrf.mxu0 }
  0x90   :  { %v63_v11 = vadd.f32 %v62_v10, %v28_v9 }
  0x92   :  { %v74_v12 = vpack.c.bf16 %v63_v11, %v63_v11  ;;  %66 = vadd.xlane.f32.xlu0 %v63_v11  ;;  %v70_v13 = vmul.f32 %v63_v11, %v63_v11 }
  0x94   :  { %75 = vst [vmem:[%s159_s3] sm:$0xf] %v74_v12  ;;  %71 = vadd.xlane.f32.xlu1 %v70_v13 }
  0x97   :  { %v64_v14 = vpop.f32.mrf.mxu0 }
 0x105   :  { %v67_v15 = vpop.xlane.xlu0 %66 }
 0x106   :  { %69 = vst.msk [vmem:[%s160_s4] sm:$0xff] %vm68_vm2, %v67_v15 }
 0x107   :  { %v72_v16 = vpop.xlane.xlu1 %71 }
 0x108   :  { %73 = vst.msk [vmem:[%s161_s5] sm:$0xff] %vm68_vm2, %v72_v16 }

// kernel: local_block_forward.26
= control target key start
LH: loop header
LB: loop body
LE: loop exit
PB: predicated region body
PF: predicated region fallthrough
CT: control target
= control target key end

     0   :  { %v127_v1 = vmov 0   ;;  %vm65_vm0 = vcmask 1043456   ;;  %vm61_vm1 = vcmask 588800   ;;  %vm84_vm2 = vcmask 7168   ;;  %s188_s0 = inlined_call_operand.vmem [shape: bf16[72,128], index: 0, kind: input, shape index: {}]   ;;  %s189_s2 = inlined_call_operand.vmem [shape: f32[8,1], index: 2, kind: input, shape index: {}]   ;;  %s190_s1 = inlined_call_operand.vmem [shape: bf16[8,72], index: 1, kind: input, shape index: {}]   ;;  %s191_s3 = inlined_call_operand.vmem [shape: bf16[8,128], index: 3, kind: output, shape index: {0}]   ;;  %s192_s4 = inlined_call_operand.vmem [shape: f32[1,8,1], index: 4, kind: output, shape index: {1}]   ;;  %s193_s5 = inlined_call_operand.vmem [shape: f32[1,8,1], index: 5, kind: output, shape index: {2}]  }
   0x1   :  { %v27_v0 = vld [vmem:[%s188_s0 + $0x20] sm:$0xf]  ;;  %126 = vset.pattern.permute.xlu0 %v127_v1  ;;  %v124_v6 = vld [vmem:[%s188_s0 + $0x18] sm:$0xff]  ;;  %v123_v7 = vld [vmem:[%s188_s0 + $0x10] sm:$0xff] }
   0x2   :  { %v51_v2 = vunpack.c.l.b16 %v27_v0  ;;  %v28_v3 = vld [vmem:[%s189_s2] sm:$0xff]  ;;  %v122_v8 = vld [vmem:[%s188_s0 + $0x8] sm:$0xff] }
   0x3   :  { %31 = vperm.xlu0 %126, %v28_v3   ;;  %v121_v9 = vld [vmem:[%s188_s0] sm:$0xff] }
   0x4   :  { %v56_v4 = vpack.c.b16 %v51_v2, %v51_v2  ;;  %v18_v10 = vld [vmem:[%s190_s1] sm:$0xf] }
   0x6   :  { %v67_v5 = vsel %vm65_vm0, %v56_v4, 0 }
   0x7   :  { %72 = vmatpush.bf16.msra.mxu0 %v67_v5 }
   0xb   :  { %73 = vmatpush.bf16.msra.mxu0 %v124_v6 }
   0xf   :  { %74 = vmatpush.bf16.msra.mxu0 %v123_v7 }
  0x13   :  { %75 = vmatpush.bf16.msra.mxu0 %v122_v8 }
  0x17   :  { %76 = vmatpush.bf16.msra.mxu0 %v121_v9 }
  0x1a   :  { %120 = vmatmul.msk.bf16.vlgmr.msra.gmra.mxu0 %vm61_vm1, %v18_v10 }
  0x75   :  { %v32_v11 = vpop.permute.xlu0 %31 }
  0x97   :  { %v78_v12 = vpop.f32.mrf.mxu0 }
  0x98   :  { %v79_v13 = vadd.f32 %v78_v12, %v32_v11 }
  0x9a   :  { %v90_v14 = vpack.c.bf16 %v79_v13, %v79_v13  ;;  %82 = vadd.xlane.f32.xlu0 %v79_v13  ;;  %v86_v15 = vmul.f32 %v79_v13, %v79_v13 }
  0x9c   :  { %91 = vst [vmem:[%s191_s3] sm:$0xf] %v90_v14  ;;  %87 = vadd.xlane.f32.xlu1 %v86_v15 }
  0x9f   :  { %v80_v16 = vpop.f32.mrf.mxu0 }
 0x10d   :  { %v83_v17 = vpop.xlane.xlu0 %82 }
 0x10e   :  { %85 = vst.msk [vmem:[%s192_s4] sm:$0xff] %vm84_vm2, %v83_v17 }
 0x10f   :  { %v88_v18 = vpop.xlane.xlu1 %87 }
 0x110   :  { %89 = vst.msk [vmem:[%s193_s5] sm:$0xff] %vm84_vm2, %v88_v18 }

// kernel: local_block_forward.20
= control target key start
LH: loop header
LB: loop body
LE: loop exit
PB: predicated region body
PF: predicated region fallthrough
CT: control target
= control target key end

     0   :  { %v233_v2 = vmov 0   ;;  %vm89_vm0 = vcmask 1041408   ;;  %vm85_vm1 = vcmask 293888   ;;  %vm159_vm2 = vcmask 7168   ;;  %s340_s0 = inlined_call_operand.vmem [shape: bf16[36,512], index: 0, kind: input, shape index: {}]   ;;  %s341_s2 = inlined_call_operand.vmem [shape: f32[8,1], index: 2, kind: input, shape index: {}]   ;;  %s342_s1 = inlined_call_operand.vmem [shape: bf16[8,36], index: 1, kind: input, shape index: {}]   ;;  %s343_s3 = inlined_call_operand.vmem [shape: bf16[8,512], index: 3, kind: output, shape index: {0}]   ;;  %s344_s4 = inlined_call_operand.vmem [shape: f32[1,8,1], index: 4, kind: output, shape index: {1}]   ;;  %s345_s5 = inlined_call_operand.vmem [shape: f32[1,8,1], index: 5, kind: output, shape index: {2}]  }
   0x1   :  { %v27_v0 = vld [vmem:[%s340_s0 + $0x40] sm:$0x33]  ;;  %v28_v1 = vld [vmem:[%s340_s0 + $0x48] sm:$0x33]  ;;  %232 = vset.pattern.permute.xlu0 %v233_v2  ;;  %v229_v8 = vld [vmem:[%s340_s0 + $0x2c] sm:$0xf0] }
   0x2   :  { %v61_v3 = vunpack.c.l.b16 %v27_v0  ;;  %v62_v4 = vunpack.c.h.b16 %v27_v0  ;;  %v63_v5 = vunpack.c.l.b16 %v28_v1  ;;  %v64_v6 = vunpack.c.h.b16 %v28_v1  ;;  %v205_v7 = vld [vmem:[%s340_s0 + $0x20] sm:$0xf]  ;;  %v227_v13 = vld [vmem:[%s340_s0 + $0x24] sm:$0xf]  ;;  %v207_v14 = vld [vmem:[%s340_s0 + $0x30] sm:$0xf0] }
   0x3   :  { %v213_v15 = vld [vmem:[%s340_s0 + $0x28] sm:$0xf]  ;;  %v230_v16 = vld [vmem:[%s340_s0 + $0x34] sm:$0xf0]  ;;  %v228_v17 = vld [vmem:[%s340_s0 + $0x2c] sm:$0xf]  ;;  %v206_v23 = vor.u32 %v229_v8, %v205_v7  ;;  %v210_v24 = vor.u32 %v227_v13, %v207_v14 }
   0x4   :  { %v73_v9 = vpack.c.b16 %v61_v3, %v61_v3  ;;  %v74_v10 = vpack.c.b16 %v62_v4, %v62_v4  ;;  %v75_v11 = vpack.c.b16 %v63_v5, %v63_v5  ;;  %v76_v12 = vpack.c.b16 %v64_v6, %v64_v6  ;;  %v215_v18 = vld [vmem:[%s340_s0 + $0x38] sm:$0xf0]  ;;  %v189_v25 = vld [vmem:[%s340_s0] sm:$0xf]  ;;  %v225_v26 = vld [vmem:[%s340_s0 + $0xc] sm:$0xf0] }
   0x5   :  { %v223_v27 = vld [vmem:[%s340_s0 + $0x4] sm:$0xf]  ;;  %v214_v28 = vor.u32 %v230_v16, %v213_v15  ;;  %v218_v29 = vor.u32 %v228_v17, %v215_v18  ;;  %v191_v30 = vld [vmem:[%s340_s0 + $0x10] sm:$0xf0]  ;;  %v197_v31 = vld [vmem:[%s340_s0 + $0x8] sm:$0xf]  ;;  %v190_v36 = vor.u32 %v225_v26, %v189_v25 }
   0x6   :  { %v91_v19 = vsel %vm89_vm0, %v73_v9, 0  ;;  %v94_v20 = vsel %vm89_vm0, %v74_v10, 0  ;;  %v97_v21 = vsel %vm89_vm0, %v75_v11, 0  ;;  %v100_v22 = vsel %vm89_vm0, %v76_v12, 0  ;;  %v29_v32 = vld [vmem:[%s341_s2] sm:$0xff] }
   0x7   :  { %107 = vmatpush.bf16.msra.mxu0 %v91_v19  ;;  %120 = vmatpush.bf16.msra.mxu1 %v94_v20  ;;  %v226_v33 = vld [vmem:[%s340_s0 + $0x14] sm:$0xf0]  ;;  %v224_v34 = vld [vmem:[%s340_s0 + $0xc] sm:$0xf]  ;;  %v199_v35 = vld [vmem:[%s340_s0 + $0x18] sm:$0xf0]  ;;  %v194_v37 = vor.u32 %v223_v27, %v191_v30 }
   0x8   :  { %133 = vmatpush.bf16.msra.mxu2 %v97_v21  ;;  %146 = vmatpush.bf16.msra.mxu3 %v100_v22  ;;  %v198_v38 = vor.u32 %v226_v33, %v197_v31  ;;  %v202_v39 = vor.u32 %v224_v34, %v199_v35  ;;  %v18_v40 = vld [vmem:[%s342_s1] sm:$0xf] }
   0x9   :  { %32 = vperm.xlu0 %232, %v29_v32  }
   0xb   :  { %108 = vmatpush.bf16.msra.mxu0 %v206_v23  ;;  %121 = vmatpush.bf16.msra.mxu1 %v210_v24 }
   0xc   :  { %134 = vmatpush.bf16.msra.mxu2 %v214_v28  ;;  %147 = vmatpush.bf16.msra.mxu3 %v218_v29 }
   0xf   :  { %109 = vmatpush.bf16.msra.mxu0 %v190_v36  ;;  %122 = vmatpush.bf16.msra.mxu1 %v194_v37 }
  0x10   :  { %135 = vmatpush.bf16.msra.mxu2 %v198_v38  ;;  %148 = vmatpush.bf16.msra.mxu3 %v202_v39 }
  0x12   :  { %219 = vmatmul.msk.bf16.vlgmr.msra.gmra.mxu0 %vm85_vm1, %v18_v40  ;;  %220 = vmatmul.msk.bf16.vlgmr.msra.gmra.mxu1 %vm85_vm1, %v18_v40 }
  0x13   :  { %221 = vmatmul.msk.bf16.vlgmr.msra.gmra.mxu2 %vm85_vm1, %v18_v40  ;;  %222 = vmatmul.msk.bf16.vlgmr.msra.gmra.mxu3 %vm85_vm1, %v18_v40 }
  0x7b   :  { %v33_v41 = vpop.permute.xlu0 %32 }
  0x8f   :  { %v111_v42 = vpop.f32.mrf.mxu0  ;;  %v124_v43 = vpop.f32.mrf.mxu1 }
  0x90   :  { %v112_v44 = vadd.f32 %v111_v42, %v33_v41  ;;  %v125_v45 = vadd.f32 %v124_v43, %v33_v41 }
  0x92   :  { %v171_v46 = vpack.c.bf16 %v125_v45, %v112_v44  ;;  %v161_v47 = vmul.f32 %v112_v44, %v112_v44  ;;  %v162_v48 = vmul.f32 %v125_v45, %v125_v45  ;;  %v154_v49 = vadd.f32 %v125_v45, %v112_v44 }
  0x94   :  { %173 = vst [vmem:[%s343_s3] sm:$0xff] %v171_v46  ;;  %v165_v56 = vadd.f32 %v162_v48, %v161_v47 }
  0x96   :  { %v137_v50 = vpop.f32.mrf.mxu2  ;;  %v150_v51 = vpop.f32.mrf.mxu3 }
  0x97   :  { %v138_v52 = vadd.f32 %v137_v50, %v33_v41  ;;  %v151_v53 = vadd.f32 %v150_v51, %v33_v41  ;;  %v113_v54 = vpop.f32.mrf.mxu0  ;;  %v126_v55 = vpop.f32.mrf.mxu1 }
  0x99   :  { %v172_v57 = vpack.c.bf16 %v151_v53, %v138_v52  ;;  %v155_v58 = vadd.f32 %v154_v49, %v138_v52  ;;  %v163_v59 = vmul.f32 %v138_v52, %v138_v52  ;;  %v164_v61 = vmul.f32 %v151_v53, %v151_v53 }
  0x9b   :  { %174 = vst [vmem:[%s343_s3 + $0x8] sm:$0xff] %v172_v57  ;;  %v156_v60 = vadd.f32 %v155_v58, %v151_v53  ;;  %v166_v62 = vadd.f32 %v165_v56, %v163_v59 }
  0x9d   :  { %157 = vadd.xlane.f32.xlu0 %v156_v60  ;;  %v167_v63 = vadd.f32 %v166_v62, %v164_v61 }
  0x9e   :  { %v139_v0 = vpop.f32.mrf.mxu2  ;;  %v152_v1 = vpop.f32.mrf.mxu3 }
  0x9f   :  { %168 = vadd.xlane.f32.xlu1 %v167_v63 }
 0x110   :  { %v158_v2 = vpop.xlane.xlu0 %157 }
 0x111   :  { %160 = vst.msk [vmem:[%s344_s4] sm:$0xff] %vm159_vm2, %v158_v2 }
 0x112   :  { %v169_v3 = vpop.xlane.xlu1 %168 }
 0x113   :  { %170 = vst.msk [vmem:[%s345_s5] sm:$0xff] %vm159_vm2, %v169_v3 }

// kernel: local_block_forward.21
= control target key start
LH: loop header
LB: loop body
LE: loop exit
PB: predicated region body
PF: predicated region fallthrough
CT: control target
= control target key end

     0   :  { %v54_v0 = vmov 0   ;;  %s99_s1 = inlined_call_operand.vmem [shape: f32[8,1], index: 1, kind: input, shape index: {}]   ;;  %s100_s2 = inlined_call_operand.vmem [shape: f32[8,1], index: 2, kind: input, shape index: {}]   ;;  %s101_s0 = inlined_call_operand.vmem [shape: bf16[8,512], index: 0, kind: input, shape index: {}]   ;;  %s102_s3 = inlined_call_operand.vmem [shape: f32[8,512], index: 3, kind: output, shape index: {}]  }
   0x1   :  { %53 = vset.pattern.permute.xlu0 %v54_v0  ;;  %v20_v1 = vld [vmem:[%s99_s1] sm:$0xff]  ;;  %v15_v5 = vld [vmem:[%s101_s0 + $0x8] sm:$0xff] }
   0x2   :  { %23 = vperm.xlu0 %53, %v20_v1   ;;  %v30_v2 = vld [vmem:[%s100_s2] sm:$0xff]  ;;  %v18_v8 = vunpack.c.l.bf16 %v15_v5  ;;  %v19_v9 = vunpack.c.h.bf16 %v15_v5 }
   0x3   :  { %v14_v4 = vld [vmem:[%s101_s0] sm:$0xff] }
   0x4   :  { %v16_v6 = vunpack.c.l.bf16 %v14_v4  ;;  %v17_v7 = vunpack.c.h.bf16 %v14_v4 }
   0xa   :  { %33 = vperm.xlu0 %53, %v30_v2  }
  0x74   :  { %v24_v3 = vpop.permute.xlu0 %23 }
  0x75   :  { %v26_v10 = vmul.f32 %v24_v3, %v16_v6  ;;  %v27_v11 = vmul.f32 %v24_v3, %v17_v7  ;;  %v28_v12 = vmul.f32 %v24_v3, %v18_v8  ;;  %v29_v13 = vmul.f32 %v24_v3, %v19_v9 }
  0x7c   :  { %v34_v14 = vpop.permute.xlu0 %33 }
  0x7d   :  { %v36_v15 = vadd.f32 %v34_v14, %v26_v10  ;;  %v37_v16 = vadd.f32 %v34_v14, %v27_v11  ;;  %v38_v17 = vadd.f32 %v34_v14, %v28_v12  ;;  %v39_v18 = vadd.f32 %v34_v14, %v29_v13 }
  0x7f   :  { %v40_v19 = vmax.f32 %v36_v15, 0.0  ;;  %v41_v20 = vmax.f32 %v37_v16, 0.0  ;;  %v42_v21 = vmax.f32 %v38_v17, 0.0  ;;  %v43_v22 = vmax.f32 %v39_v18, 0.0 }
  0x81   :  { %44 = vst [vmem:[%s102_s3] sm:$0xff] %v40_v19 }
  0x82   :  { %45 = vst [vmem:[%s102_s3 + $0x8] sm:$0xff] %v41_v20 }
  0x83   :  { %46 = vst [vmem:[%s102_s3 + $0x10] sm:$0xff] %v42_v21 }
  0x84   :  { %47 = vst [vmem:[%s102_s3 + $0x18] sm:$0xff] %v43_v22 }

// kernel: local_block_forward.39
= control target key start
LH: loop header
LB: loop body
LE: loop exit
PB: predicated region body
PF: predicated region fallthrough
CT: control target
= control target key end

     0   :  { %v59_v0 = vmov 0   ;;  %v60_v3 = vmov 839922192   ;;  %s107_s1 = inlined_call_operand.vmem [shape: f32[4,1], index: 1, kind: input, shape index: {}]   ;;  %s108_s2 = inlined_call_operand.vmem [shape: f32[4,1], index: 2, kind: input, shape index: {}]   ;;  %s109_s0 = inlined_call_operand.vmem [shape: bf16[4,512], index: 0, kind: input, shape index: {}]   ;;  %s110_s3 = inlined_call_operand.vmem [shape: f32[4,512], index: 3, kind: input, shape index: {}]   ;;  %s111_s4 = inlined_call_operand.vmem [shape: f32[4,512], index: 4, kind: output, shape index: {}]  }
   0x1   :  { %58 = vset.pattern.permute.xlu0 %v59_v0  ;;  %v20_v1 = vld [vmem:[%s107_s1] sm:$0xf]  ;;  %v26_v4 = vunpack.c.l.s4 %v60_v3  ;;  %v47_v18 = vld [vmem:[%s110_s3 + $0x8] sm:$0xff] }
   0x2   :  { %23 = vperm.xlu0 %58, %v20_v1   ;;  %v32_v2 = vld [vmem:[%s108_s2] sm:$0xf] }
   0x3   :  { %v27_v6 = vunpack.c.0.s8 %v26_v4  ;;  %v17_v7 = vld [vmem:[%s109_s0] sm:$0xff] }
   0x4   :  { %v18_v8 = vunpack.c.l.bf16 %v17_v7  ;;  %v19_v9 = vunpack.c.h.bf16 %v17_v7  ;;  %v46_v17 = vld [vmem:[%s110_s3] sm:$0xff] }
   0xa   :  { %35 = vperm.xlu0 %58, %v32_v2  }
  0x74   :  { %v24_v5 = vpop.permute.xlu0 %23 }
  0x75   :  { %v28_v10 = vperm.slane %v24_v5, %v27_v6 }
  0x77   :  { %v30_v12 = vmul.f32 %v28_v10, %v18_v8  ;;  %v31_v13 = vmul.f32 %v28_v10, %v19_v9 }
  0x7c   :  { %v36_v11 = vpop.permute.xlu0 %35 }
  0x7d   :  { %v40_v14 = vperm.slane %v36_v11, %v27_v6 }
  0x7f   :  { %v42_v15 = vadd.f32 %v40_v14, %v30_v12  ;;  %v43_v16 = vadd.f32 %v40_v14, %v31_v13 }
  0x81   :  { %v44_v19 = vmax.f32 %v42_v15, 0.0  ;;  %v45_v20 = vmax.f32 %v43_v16, 0.0 }
  0x83   :  { %v48_v21 = vadd.f32 %v46_v17, %v44_v19  ;;  %v49_v22 = vadd.f32 %v47_v18, %v45_v20 }
  0x85   :  { %50 = vst [vmem:[%s111_s4] sm:$0xff] %v48_v21 }
  0x86   :  { %51 = vst [vmem:[%s111_s4 + $0x8] sm:$0xff] %v49_v22 }

// kernel: local_block_forward.38
= control target key start
LH: loop header
LB: loop body
LE: loop exit
PB: predicated region body
PF: predicated region fallthrough
CT: control target
= control target key end

     0   :  { %v343_v2 = vmov 0   ;;  %vm137_vm0 = vcmask 1043456   ;;  %vm133_vm1 = vcmask 588800   ;;  %vm234_vm2 = vcmask 1041408   ;;  %s504_s0 = inlined_call_operand.vmem [shape: bf16[72,512], index: 0, kind: input, shape index: {}]   ;;  %s505_s2 = inlined_call_operand.vmem [shape: f32[4,1], index: 2, kind: input, shape index: {}]   ;;  %s506_s1 = inlined_call_operand.vmem [shape: bf16[4,72], index: 1, kind: input, shape index: {}]   ;;  %s507_s3 = inlined_call_operand.vmem [shape: bf16[4,512], index: 3, kind: output, shape index: {0}]   ;;  %s508_s4 = inlined_call_operand.vmem [shape: f32[1,4,1], index: 4, kind: output, shape index: {1}]   ;;  %s509_s5 = inlined_call_operand.vmem [shape: f32[1,4,1], index: 5, kind: output, shape index: {2}]  }
   0x1   :  { %v35_v0 = vld [vmem:[%s504_s0 + $0x80] sm:$0xff]  ;;  %v36_v1 = vld [vmem:[%s504_s0 + $0x88] sm:$0xff]  ;;  %342 = vset.pattern.permute.xlu0 %v343_v2  ;;  %v339_v8 = vld [vmem:[%s504_s0 + $0x6c] sm:$0xf0]  ;;  %vm238_vm3 = vcmask 1045508   ;;  %vm211_vm4 = vcmask 3072  }
   0x2   :  { %v93_v3 = vunpack.c.l.b16 %v35_v0  ;;  %v94_v4 = vunpack.c.h.b16 %v35_v0  ;;  %v95_v5 = vunpack.c.l.b16 %v36_v1  ;;  %v96_v6 = vunpack.c.h.b16 %v36_v1  ;;  %v307_v7 = vld [vmem:[%s504_s0 + $0x60] sm:$0xf]  ;;  %v337_v13 = vld [vmem:[%s504_s0 + $0x64] sm:$0xf]  ;;  %v309_v14 = vld [vmem:[%s504_s0 + $0x70] sm:$0xf0] }
   0x3   :  { %v315_v15 = vld [vmem:[%s504_s0 + $0x68] sm:$0xf]  ;;  %v340_v16 = vld [vmem:[%s504_s0 + $0x74] sm:$0xf0]  ;;  %v338_v17 = vld [vmem:[%s504_s0 + $0x6c] sm:$0xf]  ;;  %v308_v23 = vor.u32 %v339_v8, %v307_v7  ;;  %v312_v24 = vor.u32 %v337_v13, %v309_v14 }
   0x4   :  { %v113_v9 = vpack.c.b16 %v93_v3, %v93_v3  ;;  %v114_v10 = vpack.c.b16 %v94_v4, %v94_v4  ;;  %v115_v11 = vpack.c.b16 %v95_v5, %v95_v5  ;;  %v116_v12 = vpack.c.b16 %v96_v6, %v96_v6  ;;  %v317_v18 = vld [vmem:[%s504_s0 + $0x78] sm:$0xf0]  ;;  %v291_v25 = vld [vmem:[%s504_s0 + $0x40] sm:$0xf]  ;;  %v335_v26 = vld [vmem:[%s504_s0 + $0x4c] sm:$0xf0] }
   0x5   :  { %v316_v27 = vor.u32 %v340_v16, %v315_v15  ;;  %v320_v28 = vor.u32 %v338_v17, %v317_v18  ;;  %v333_v29 = vld [vmem:[%s504_s0 + $0x44] sm:$0xf]  ;;  %v293_v30 = vld [vmem:[%s504_s0 + $0x50] sm:$0xf0]  ;;  %v299_v31 = vld [vmem:[%s504_s0 + $0x48] sm:$0xf]  ;;  %v292_v35 = vor.u32 %v335_v26, %v291_v25 }
   0x6   :  { %v139_v19 = vsel %vm137_vm0, %v113_v9, 0  ;;  %v142_v20 = vsel %vm137_vm0, %v114_v10, 0  ;;  %v145_v21 = vsel %vm137_vm0, %v115_v11, 0  ;;  %v148_v22 = vsel %vm137_vm0, %v116_v12, 0  ;;  %v336_v32 = vld [vmem:[%s504_s0 + $0x54] sm:$0xf0] }
   0x7   :  { %153 = vmatpush.bf16.msra.mxu0 %v139_v19  ;;  %166 = vmatpush.bf16.msra.mxu1 %v142_v20  ;;  %v334_v33 = vld [vmem:[%s504_s0 + $0x4c] sm:$0xf]  ;;  %v301_v34 = vld [vmem:[%s504_s0 + $0x58] sm:$0xf0]  ;;  %v296_v36 = vor.u32 %v333_v29, %v293_v30  ;;  %v275_v37 = vld [vmem:[%s504_s0 + $0x20] sm:$0xf]  ;;  %v300_v40 = vor.u32 %v336_v32, %v299_v31 }
   0x8   :  { %179 = vmatpush.bf16.msra.mxu2 %v145_v21  ;;  %192 = vmatpush.bf16.msra.mxu3 %v148_v22  ;;  %v331_v38 = vld [vmem:[%s504_s0 + $0x2c] sm:$0xf0]  ;;  %v329_v39 = vld [vmem:[%s504_s0 + $0x24] sm:$0xf]  ;;  %v304_v41 = vor.u32 %v334_v33, %v301_v34  ;;  %v277_v42 = vld [vmem:[%s504_s0 + $0x30] sm:$0xf0] }
   0x9   :  { %v283_v43 = vld [vmem:[%s504_s0 + $0x28] sm:$0xf]  ;;  %v332_v44 = vld [vmem:[%s504_s0 + $0x34] sm:$0xf0]  ;;  %v330_v45 = vld [vmem:[%s504_s0 + $0x2c] sm:$0xf]  ;;  %v276_v48 = vor.u32 %v331_v38, %v275_v37  ;;  %v280_v49 = vor.u32 %v329_v39, %v277_v42 }
   0xa   :  { %v285_v46 = vld [vmem:[%s504_s0 + $0x38] sm:$0xf0]  ;;  %v37_v47 = vld [vmem:[%s505_s2] sm:$0xf]  ;;  %v327_v51 = vld [vmem:[%s504_s0 + $0xc] sm:$0xf0]  ;;  %v284_v52 = vor.u32 %v332_v44, %v283_v43 }
   0xb   :  { %154 = vmatpush.bf16.msra.mxu0 %v308_v23  ;;  %167 = vmatpush.bf16.msra.mxu1 %v312_v24  ;;  %v259_v50 = vld [vmem:[%s504_s0] sm:$0xf]  ;;  %v288_v53 = vor.u32 %v330_v45, %v285_v46  ;;  %v325_v54 = vld [vmem:[%s504_s0 + $0x4] sm:$0xf]  ;;  %v261_v55 = vld [vmem:[%s504_s0 + $0x10] sm:$0xf0] }
   0xc   :  { %180 = vmatpush.bf16.msra.mxu2 %v316_v27  ;;  %193 = vmatpush.bf16.msra.mxu3 %v320_v28  ;;  %v267_v56 = vld [vmem:[%s504_s0 + $0x8] sm:$0xf]  ;;  %v328_v57 = vld [vmem:[%s504_s0 + $0x14] sm:$0xf0]  ;;  %v326_v58 = vld [vmem:[%s504_s0 + $0xc] sm:$0xf]  ;;  %v260_v60 = vor.u32 %v327_v51, %v259_v50  ;;  %v264_v61 = vor.u32 %v325_v54, %v261_v55 }
   0xd   :  { %40 = vperm.xlu0 %342, %v37_v47   ;;  %v269_v59 = vld [vmem:[%s504_s0 + $0x18] sm:$0xf0]  ;;  %v268_v62 = vor.u32 %v328_v57, %v267_v56  ;;  %v18_v0 = vld [vmem:[%s506_s1] sm:$0x3] }
   0xe   :  { %v272_v63 = vor.u32 %v326_v58, %v269_v59 }
   0xf   :  { %155 = vmatpush.bf16.msra.mxu0 %v292_v35  ;;  %168 = vmatpush.bf16.msra.mxu1 %v296_v36 }
  0x10   :  { %181 = vmatpush.bf16.msra.mxu2 %v300_v40  ;;  %194 = vmatpush.bf16.msra.mxu3 %v304_v41 }
  0x13   :  { %156 = vmatpush.bf16.msra.mxu0 %v276_v48  ;;  %169 = vmatpush.bf16.msra.mxu1 %v280_v49 }
  0x14   :  { %182 = vmatpush.bf16.msra.mxu2 %v284_v52  ;;  %195 = vmatpush.bf16.msra.mxu3 %v288_v53 }
  0x17   :  { %157 = vmatpush.bf16.msra.mxu0 %v260_v60  ;;  %170 = vmatpush.bf16.msra.mxu1 %v264_v61 }
  0x18   :  { %183 = vmatpush.bf16.msra.mxu2 %v268_v62  ;;  %196 = vmatpush.bf16.msra.mxu3 %v272_v63 }
  0x1a   :  { %321 = vmatmul.msk.bf16.vlgmr.msra.gmra.mxu0 %vm133_vm1, %v18_v0  ;;  %322 = vmatmul.msk.bf16.vlgmr.msra.gmra.mxu1 %vm133_vm1, %v18_v0 }
  0x1b   :  { %323 = vmatmul.msk.bf16.vlgmr.msra.gmra.mxu2 %vm133_vm1, %v18_v0  ;;  %324 = vmatmul.msk.bf16.vlgmr.msra.gmra.mxu3 %vm133_vm1, %v18_v0 }
  0x7f   :  { %v41_v1 = vpop.permute.xlu0 %40 }
  0x97   :  { %v159_v2 = vpop.f32.mrf.mxu0  ;;  %v172_v3 = vpop.f32.mrf.mxu1 }
  0x98   :  { %v160_v4 = vadd.f32 %v159_v2, %v41_v1  ;;  %v173_v5 = vadd.f32 %v172_v3, %v41_v1 }
  0x9a   :  { %v213_v6 = vmul.f32 %v160_v4, %v160_v4  ;;  %v202_v7 = vsel %vm137_vm0, %v160_v4, 0.0  ;;  %v203_v8 = vsel %vm137_vm0, %v173_v5, 0.0  ;;  %v214_v9 = vmul.f32 %v173_v5, %v173_v5 }
  0x9b   :  { %v227_v10 = vpack.c.bf16 %v173_v5, %v160_v4  ;;  %v204_v15 = vadd.f32 %v203_v8, %v202_v7 }
  0x9c   :  { %v217_v11 = vsel %vm137_vm0, %v213_v6, 0.0  ;;  %v218_v12 = vsel %vm137_vm0, %v214_v9, 0.0 }
  0x9d   :  { %v219_v20 = vadd.f32 %v218_v12, %v217_v11  ;;  %v231_v21 = vrot.slane %v227_v10, 2 }
  0x9e   :  { %v185_v13 = vpop.f32.mrf.mxu2  ;;  %v198_v14 = vpop.f32.mrf.mxu3 }
  0x9f   :  { %v186_v16 = vadd.f32 %v185_v13, %v41_v1  ;;  %v199_v17 = vadd.f32 %v198_v14, %v41_v1  ;;  %v161_v18 = vpop.f32.mrf.mxu0  ;;  %v174_v19 = vpop.f32.mrf.mxu1  ;;  %v237_v33 = vsel %vm234_vm2, %v227_v10, %v231_v21 }
  0xa1   :  { %v228_v22 = vpack.c.bf16 %v199_v17, %v186_v16  ;;  %v205_v23 = vsel %vm137_vm0, %v186_v16, 0.0  ;;  %v215_v24 = vmul.f32 %v186_v16, %v186_v16  ;;  %v216_v26 = vmul.f32 %v199_v17, %v199_v17 }
  0xa2   :  { %v206_v25 = vadd.f32 %v205_v23, %v204_v15  ;;  %v207_v29 = vsel %vm137_vm0, %v199_v17, 0.0 }
  0xa3   :  { %v232_v27 = vrot.slane %v228_v22, 4  ;;  %v233_v28 = vrot.slane %v228_v22, 6  ;;  %v220_v30 = vsel %vm137_vm0, %v215_v24, 0.0  ;;  %v222_v35 = vsel %vm137_vm0, %v216_v26, 0.0 }
  0xa4   :  { %v208_v31 = vadd.f32 %v207_v29, %v206_v25  ;;  %v221_v32 = vadd.f32 %v220_v30, %v219_v20 }
  0xa5   :  { %v241_v34 = vsel %vm238_vm3, %v232_v27, %v233_v28 }
  0xa6   :  { %v242_v36 = vsel %vm137_vm0, %v237_v33, %v241_v34  ;;  %v187_v37 = vpop.f32.mrf.mxu2  ;;  %v200_v38 = vpop.f32.mrf.mxu3  ;;  %209 = vadd.xlane.f32.xlu0 %v208_v31  ;;  %v223_v39 = vadd.f32 %v222_v35, %v221_v32 }
  0xa7   :  { %244 = vst [vmem:[%s507_s3] sm:$0xff] %v242_v36 }
  0xa8   :  { %224 = vadd.xlane.f32.xlu1 %v223_v39 }
 0x119   :  { %v210_v40 = vpop.xlane.xlu0 %209 }
 0x11a   :  { %212 = vst.msk [vmem:[%s508_s4] sm:$0xf] %vm211_vm4, %v210_v40 }
 0x11b   :  { %v225_v41 = vpop.xlane.xlu1 %224 }
 0x11c   :  { %226 = vst.msk [vmem:[%s509_s5] sm:$0xf] %vm211_vm4, %v225_v41 }

</bundles_post_ra>
